<compile_context>
chip_gen: v7x
topology: tpu7x:2x2x1
jax: 0.10.0
libtpu: 0.0.40
codegen_flags: <defaults>
</compile_context>

<pallas_src>
import jax
import jax.numpy as jnp
from jax import lax
from jax.experimental import pallas as pl
from jax.experimental.pallas import tpu as pltpu

ALPHA = 0.5
BETA = 0.5
GAMMA = 1

_LANE = 128
_SUBLANE = 8
_TM_MAX = 2048      # rows per tile: 2048*128 f32 = 1 MiB/block -> ~4 MiB VMEM
_NCORES = 2         # v7x megacore split; harmless (serial) on v5e/v6e


def _make_kernel(n_valid, steps_per_core, tm):
    """n_valid / steps_per_core / tm are trace-time Python ints."""

    def kernel(x_ref, t_ref, out_ref):
        c = pl.program_id(0)          # core-parallel axis
        i = pl.program_id(1)          # reduction axis (carried accumulator)

        @pl.when(i == 0)
        def _init():
            out_ref[...] = jnp.zeros_like(out_ref)

        xf = x_ref[...].astype(jnp.float32)      # (tm, 128)
        tf = t_ref[...].astype(jnp.float32)

        # sigmoid(x) = 0.5 + 0.5*tanh(0.5*x)  -> EUP, no f32 divide sequence.
        s = 0.5 + 0.5 * jnp.tanh(0.5 * xf)

        # Mask the ragged tail; also zeroes out fully-OOB (clamped) tiles.
        tile_idx = c * steps_per_core + i
        base = tile_idx * (tm * _LANE)
        row = lax.broadcasted_iota(jnp.int32, (tm, _LANE), 0)
        col = lax.broadcasted_iota(jnp.int32, (tm, _LANE), 1)
        mask = (base + row * _LANE + col) < n_valid

        s = jnp.where(mask, s, 0.0)
        tf = jnp.where(mask, tf, 0.0)

        def fold(v):
            # (tm, 128) -> (8, 128): layout-preserving reshape + pure vreg adds.
            return jnp.sum(v.reshape(tm // _SUBLANE, _SUBLANE, _LANE), axis=0)

        out_ref[0] = out_ref[0] + fold(s)        # sum sigmoid(x)
        out_ref[1] = out_ref[1] + fold(tf)       # sum t
        out_ref[2] = out_ref[2] + fold(s * tf)   # sum sigmoid(x) * t  (TP)

    return kernel


def _pick_tm(m):
    # Large fixed tile, capped by the array extent; always a multiple of 8
    # (except the <8-row degenerate case, where the single partial block is
    # still handled by the cdiv grid + mask).
    return max(_SUBLANE, min(_TM_MAX, (m // _SUBLANE) * _SUBLANE))


def focal_tversky_loss(inputs, targets, smooth=1.0, alpha=ALPHA, beta=BETA,
                       gamma=GAMMA):
    """Pallas TPU implementation of FocalTverskyLoss.forward."""
    x = inputs.reshape(-1)            # native dtype, no astype copy
    t = targets.reshape(-1)
    n = x.shape[0]

    # Only needed to present a lane-dense (m, 128) view; values are masked
    # in-kernel so zeros are fine.  Rare path (n % 128 != 0).
    pad = (-n) % _LANE
    if pad:
        x = jnp.pad(x, (0, pad))
        t = jnp.pad(t, (0, pad))

    m = (n + pad) // _LANE
    x2 = x.reshape(m, _LANE)
    t2 = t.reshape(m, _LANE)

    tm = _pick_tm(m)
    num_tiles = pl.cdiv(m, tm)
    steps_per_core = pl.cdiv(num_tiles, _NCORES)
    grid = (_NCORES, steps_per_core)

    def in_map(c, i):
        # Clamp so we never request a block past the array; fully-OOB logical
        # tiles are zeroed by the in-kernel mask anyway.
        return (jnp.minimum(c * steps_per_core + i, num_tiles - 1), 0)

    partials = pl.pallas_call(
        _make_kernel(n, steps_per_core, tm),
        out_shape=jax.ShapeDtypeStruct((_NCORES * 3, _SUBLANE, _LANE),
                                       jnp.float32),
        grid_spec=pltpu.PrefetchScalarGridSpec(
            num_scalar_prefetch=0,
            grid=grid,
            in_specs=[
                pl.BlockSpec((tm, _LANE), in_map),
                pl.BlockSpec((tm, _LANE), in_map),
            ],
            out_specs=pl.BlockSpec((3, _SUBLANE, _LANE),
                                   lambda c, i: (c, 0, 0)),
        ),
        compiler_params=pltpu.CompilerParams(
            dimension_semantics=("parallel", "arbitrary")),
    )(x2, t2)

    # Final cross-lane reduction + Tversky math: O(1) work, done in XLA.
    sums = partials.reshape(_NCORES, 3, -1).sum(axis=(0, 2))
    sum_s, sum_t, tp = sums[0], sums[1], sums[2]
    fp = sum_s - tp                   # sum((1 - t) * s)
    fn = sum_t - tp                   # sum(t * (1 - s))
    tversky = (tp + smooth) / (tp + alpha * fp + beta * fn + smooth)
    focal = 1.0 - tversky
    if gamma != 1:                    # trace-time constant branch
        focal = focal ** gamma
    return focal


def _reference(inputs, targets, smooth=1.0, alpha=ALPHA, beta=BETA, gamma=GAMMA):
    """Pure-JAX restatement of the torch forward (sanity check)."""
    s = jax.nn.sigmoid(inputs.astype(jnp.float32)).reshape(-1)
    t = targets.astype(jnp.float32).reshape(-1)
    tp = jnp.sum(s * t)
    fp = jnp.sum((1.0 - t) * s)
    fn = jnp.sum(t * (1.0 - s))
    tversky = (tp + smooth) / (tp + alpha * fp + beta * fn + smooth)
    return (1.0 - tversky) ** gamma


if __name__ == "__main__":
    key = jax.random.PRNGKey(0)
    ki, kt = jax.random.split(key)
    B, C, H, W = 2, 4, 16, 16
    inputs = jax.random.normal(ki, (B, C, H, W), dtype=jnp.float32)
    targets = jax.random.bernoulli(kt, 0.3, (B, C, H, W)).astype(jnp.float32)

    out = jax.block_until_ready(focal_tversky_loss(inputs, targets))
    ref = jax.block_until_ready(_reference(inputs, targets))

    assert jnp.allclose(out, ref, rtol=1e-4, atol=1e-4), (out, ref)
    print("KERNEL_OK")
</pallas_src>

<mosaic_0001>
module attributes {stable_mosaic.version = 11 : i64} {
  func.func @kernel(%arg0: i32, %arg1: i32, %arg2: memref<16x128xf32, #tpu.memory_space<vmem>>, %arg3: memref<16x128xf32, #tpu.memory_space<vmem>>, %arg4: memref<3x8x128xf32, #tpu.memory_space<vmem>>) attributes {dimension_semantics = [#tpu.dimension_semantics<parallel>, #tpu.dimension_semantics<arbitrary>], iteration_bounds = array<i64: 2, 1>, scalar_prefetch = 0 : i64, scratch_operands = 0 : i64, tpu.core_type = #tpu.core_type<tc>, window_params = [{transform_indices = @transform_0, window_bounds = array<i64: 16, 128>}, {transform_indices = @transform_1, window_bounds = array<i64: 16, 128>}, {transform_indices = @transform_2, window_bounds = array<i64: 3, 8, 128>}]} {
    %c0_i32 = arith.constant 0 : i32
    %0 = arith.cmpi eq, %arg1, %c0_i32 : i32
    %1 = arith.extui %0 : i1 to i32
    %c0_i32_0 = arith.constant 0 : i32
    %2 = arith.cmpi ne, %1, %c0_i32_0 : i32
    scf.if %2 {
      %cst_28 = arith.constant 0.000000e+00 : f32
      %53 = vector.broadcast %cst_28 : f32 to vector<3x8x128xf32>
      %c0_29 = arith.constant 0 : index
      %c0_30 = arith.constant 0 : index
      %c0_31 = arith.constant 0 : index
      %54 = vector.load %arg4[%c0_29, %c0_30, %c0_31] : memref<3x8x128xf32, #tpu.memory_space<vmem>>, vector<3x8x128xf32>
      tpu.vector_store %arg4[%c0_29, %c0_30, %c0_31], %53 {strides = array<i32>} : memref<3x8x128xf32, #tpu.memory_space<vmem>>, vector<3x8x128xf32>,
    } else {
    }
    %c0 = arith.constant 0 : index
    %c0_1 = arith.constant 0 : index
    %3 = vector.load %arg2[%c0, %c0_1] : memref<16x128xf32, #tpu.memory_space<vmem>>, vector<16x128xf32>
    %c0_2 = arith.constant 0 : index
    %c0_3 = arith.constant 0 : index
    %4 = vector.load %arg3[%c0_2, %c0_3] : memref<16x128xf32, #tpu.memory_space<vmem>>, vector<16x128xf32>
    %cst = arith.constant 5.000000e-01 : f32
    %5 = vector.broadcast %cst : f32 to vector<16x128xf32>
    %6 = arith.mulf %5, %3 : vector<16x128xf32>
    %7 = math.tanh %6 : vector<16x128xf32>
    %cst_4 = arith.constant 5.000000e-01 : f32
    %8 = vector.broadcast %cst_4 : f32 to vector<16x128xf32>
    %9 = arith.mulf %8, %7 : vector<16x128xf32>
    %cst_5 = arith.constant 5.000000e-01 : f32
    %10 = vector.broadcast %cst_5 : f32 to vector<16x128xf32>
    %11 = arith.addf %10, %9 : vector<16x128xf32>
    %c1_i32 = arith.constant 1 : i32
    %12 = arith.muli %arg0, %c1_i32 : i32
    %13 = arith.addi %12, %arg1 : i32
    %c2048_i32 = arith.constant 2048 : i32
    %14 = arith.muli %13, %c2048_i32 : i32
    %15 = tpu.iota {dimensions = array<i32: 0>} : vector<16x128xi32>
    %16 = tpu.iota {dimensions = array<i32: 1>} : vector<16x128xi32>
    %c128_i32 = arith.constant 128 : i32
    %17 = vector.broadcast %c128_i32 : i32 to vector<16x128xi32>
    %18 = arith.muli %15, %17 : vector<16x128xi32>
    %19 = vector.broadcast %14 : i32 to vector<16x128xi32>
    %20 = arith.addi %19, %18 : vector<16x128xi32>
    %21 = arith.addi %20, %16 : vector<16x128xi32>
    %c2048_i32_6 = arith.constant 2048 : i32
    %22 = vector.broadcast %c2048_i32_6 : i32 to vector<16x128xi32>
    %23 = arith.cmpi slt, %21, %22 : vector<16x128xi32>
    %cst_7 = arith.constant 0.000000e+00 : f32
    %24 = vector.broadcast %cst_7 : f32 to vector<16x128xf32>
    %25 = arith.select %23, %11, %24 : vector<16x128xi1>, vector<16x128xf32>
    %cst_8 = arith.constant 0.000000e+00 : f32
    %26 = vector.broadcast %cst_8 : f32 to vector<16x128xf32>
    %27 = arith.select %23, %4, %26 : vector<16x128xi1>, vector<16x128xf32>
    %c0_9 = arith.constant 0 : index
    %c0_10 = arith.constant 0 : index
    %c0_11 = arith.constant 0 : index
    %28 = vector.load %arg4[%c0_9, %c0_10, %c0_11] : memref<3x8x128xf32, #tpu.memory_space<vmem>>, vector<1x8x128xf32>
    %29 = vector.shape_cast %28 : vector<1x8x128xf32> to vector<8x128xf32>
    %30 = vector.shape_cast %25 : vector<16x128xf32> to vector<2x8x128xf32>
    %cst_12 = arith.constant dense<0.000000e+00> : vector<8x128xf32>
    %31 = vector.multi_reduction <add>, %30, %cst_12 [0] : vector<2x8x128xf32> to vector<8x128xf32>
    %32 = arith.addf %29, %31 : vector<8x128xf32>
    %c0_13 = arith.constant 0 : index
    %c0_14 = arith.constant 0 : index
    %c0_15 = arith.constant 0 : index
    %33 = vector.load %arg4[%c0_13, %c0_14, %c0_15] : memref<3x8x128xf32, #tpu.memory_space<vmem>>, vector<1x8x128xf32>
    %34 = vector.shape_cast %33 : vector<1x8x128xf32> to vector<8x128xf32>
    %35 = vector.shape_cast %32 : vector<8x128xf32> to vector<1x8x128xf32>
    tpu.vector_store %arg4[%c0_13, %c0_14, %c0_15], %35 {strides = array<i32>} : memref<3x8x128xf32, #tpu.memory_space<vmem>>, vector<1x8x128xf32>,
    %c1 = arith.constant 1 : index
    %c0_16 = arith.constant 0 : index
    %c0_17 = arith.constant 0 : index
    %36 = vector.load %arg4[%c1, %c0_16, %c0_17] : memref<3x8x128xf32, #tpu.memory_space<vmem>>, vector<1x8x128xf32>
    %37 = vector.shape_cast %36 : vector<1x8x128xf32> to vector<8x128xf32>
    %38 = vector.shape_cast %27 : vector<16x128xf32> to vector<2x8x128xf32>
    %cst_18 = arith.constant dense<0.000000e+00> : vector<8x128xf32>
    %39 = vector.multi_reduction <add>, %38, %cst_18 [0] : vector<2x8x128xf32> to vector<8x128xf32>
    %40 = arith.addf %37, %39 : vector<8x128xf32>
    %c1_19 = arith.constant 1 : index
    %c0_20 = arith.constant 0 : index
    %c0_21 = arith.constant 0 : index
    %41 = vector.load %arg4[%c1_19, %c0_20, %c0_21] : memref<3x8x128xf32, #tpu.memory_space<vmem>>, vector<1x8x128xf32>
    %42 = vector.shape_cast %41 : vector<1x8x128xf32> to vector<8x128xf32>
    %43 = vector.shape_cast %40 : vector<8x128xf32> to vector<1x8x128xf32>
    tpu.vector_store %arg4[%c1_19, %c0_20, %c0_21], %43 {strides = array<i32>} : memref<3x8x128xf32, #tpu.memory_space<vmem>>, vector<1x8x128xf32>,
    %c2 = arith.constant 2 : index
    %c0_22 = arith.constant 0 : index
    %c0_23 = arith.constant 0 : index
    %44 = vector.load %arg4[%c2, %c0_22, %c0_23] : memref<3x8x128xf32, #tpu.memory_space<vmem>>, vector<1x8x128xf32>
    %45 = vector.shape_cast %44 : vector<1x8x128xf32> to vector<8x128xf32>
    %46 = arith.mulf %25, %27 : vector<16x128xf32>
    %47 = vector.shape_cast %46 : vector<16x128xf32> to vector<2x8x128xf32>
    %cst_24 = arith.constant dense<0.000000e+00> : vector<8x128xf32>
    %48 = vector.multi_reduction <add>, %47, %cst_24 [0] : vector<2x8x128xf32> to vector<8x128xf32>
    %49 = arith.addf %45, %48 : vector<8x128xf32>
    %c2_25 = arith.constant 2 : index
    %c0_26 = arith.constant 0 : index
    %c0_27 = arith.constant 0 : index
    %50 = vector.load %arg4[%c2_25, %c0_26, %c0_27] : memref<3x8x128xf32, #tpu.memory_space<vmem>>, vector<1x8x128xf32>
    %51 = vector.shape_cast %50 : vector<1x8x128xf32> to vector<8x128xf32>
    %52 = vector.shape_cast %49 : vector<8x128xf32> to vector<1x8x128xf32>
    tpu.vector_store %arg4[%c2_25, %c0_26, %c0_27], %52 {strides = array<i32>} : memref<3x8x128xf32, #tpu.memory_space<vmem>>, vector<1x8x128xf32>,
    return
  }
  func.func @transform_0(%arg0: i32, %arg1: i32) -> (i32, i32) {
    %c1_i32 = arith.constant 1 : i32
    %0 = arith.muli %arg0, %c1_i32 : i32
    %1 = arith.addi %0, %arg1 : i32
    %c0_i32 = arith.constant 0 : i32
    %2 = arith.minsi %1, %c0_i32 : i32
    %c0_i32_0 = arith.constant 0 : i32
    %c0_i32_1 = arith.constant 0 : i32
    return %2, %c0_i32_0 : i32, i32
  }
  func.func @transform_1(%arg0: i32, %arg1: i32) -> (i32, i32) {
    %c1_i32 = arith.constant 1 : i32
    %0 = arith.muli %arg0, %c1_i32 : i32
    %1 = arith.addi %0, %arg1 : i32
    %c0_i32 = arith.constant 0 : i32
    %2 = arith.minsi %1, %c0_i32 : i32
    %c0_i32_0 = arith.constant 0 : i32
    %c0_i32_1 = arith.constant 0 : i32
    return %2, %c0_i32_0 : i32, i32
  }
  func.func @transform_2(%arg0: i32, %arg1: i32) -> (i32, i32, i32) {
    %c0_i32 = arith.constant 0 : i32
    %c0_i32_0 = arith.constant 0 : i32
    %c0_i32_1 = arith.constant 0 : i32
    return %arg0, %c0_i32, %c0_i32_0 : i32, i32, i32
  }
}

</mosaic_0001>

<bundles_post_ra>
// kernel: tpu_custom_call.1
= control target key start
LH: loop header
LB: loop body
LE: loop exit
PB: predicated region body
PF: predicated region fallthrough
CT: control target
= control target key end

     0   :  { %7 = vsyncpa [#allocation3], 0  ;;  %s943_s0 = inlined_call_operand.hbm [shape: f32[16,128], index: 0, kind: input, shape index: {}]   ;;  %s944_s1 = inlined_call_operand.hbm [shape: f32[16,128], index: 1, kind: input, shape index: {}]   ;;  %s945_s2 = inlined_call_operand.hbm [shape: f32[6,8,128], index: 2, kind: output, shape index: {}]  }
   0x1   :  { %9 = vsyncpa [#allocation3 + $0x1], 0 }
   0x2   :  { %10 = vsyncpa [#allocation6], 0 }
   0x3   :  { %12 = vsyncpa [#allocation6 + $0x1], 0 }
   0x4   :  { %13 = vsyncpa [#allocation4], 0 }
   0x5   :  { %15 = vsyncpa [#allocation4 + $0x1], 0  ;;  %s730_s9 = smov 0   ;;  %s732_s10 = smov 0  }
   0x6   :  { %s734_s11 = smov 0   ;;  %s736_s12 = smov 0  }
   0x7   :  { %s738_s13 = smov 0   ;;  %s740_s14 = smov 0  }
   0x8   :  { %s742_s15 = smov 0   ;;  %s744_s16 = smov 0  }
   0x9 LB: > { %s414_s17 = sadd.s32 4294967295, %s706_s16   ;;  %s415_s18 = sadd.s32 4294967294, %s706_s16   ;;  %s706_s16 = sphi %s744_s16, %s21_s16   ;;  %s702_s15 = sphi %s742_s15, %s964_s15   ;;  %s698_s14 = sphi %s740_s14, %s963_s14   ;;  %s694_s13 = sphi %s738_s13, %s933_s13   ;;  %s690_s12 = sphi %s736_s12, %s962_s12   ;;  %s686_s11 = sphi %s734_s11, %s961_s11   ;;  %s682_s10 = sphi %s732_s10, %s960_s10   ;;  %s678_s9 = sphi %s730_s9, %s959_s9  }
   0xa   : > { %s33_s19 = sadd.s32 1, %s702_s15  ;;  %p675_p1 = scmp.ne.s32.totalorder %s694_s13, 0 }
   0xb   : > { %p35_p0 = scmp.ge.s32.totalorder %s33_s19, 2  ;;  %p54_p2 = scmp.eq.s32.totalorder %s706_s16, 0 }
   0xc   : > { %p59_p3 = scmp.ne.s32.totalorder %s694_s13, %s690_s12  ;;  %p60_p5 = scmp.eq.s32.totalorder %s414_s17, 0 }
   0xd   : > { %s966_s19 = smov (%p35_p0, %s33_s19), 0  ;;  %p776_p4 = por %p675_p1, %p54_p2 }
   0xe   : > { %p780_p6 = por %p60_p5, %p59_p3  ;;  %s101_s22 = ssub.s32 %s702_s15, %s966_s19 }
   0xf   : > { %p102_p7 = scmp.eq.s32.totalorder %s101_s22, 0  ;;  %s104_s23 = sadd.s32 1, %s686_s11 }
  0x10   : > { %s949_s21 = scalar_select %p780_p6, 1, 0 }
  0x11   : > { %s788_s24 = scalar_select %p102_p7, %s686_s11, %s104_s23  }
  0x12   : > { %p114_p8 = scmp.ne.s32.totalorder %s686_s11, %s682_s10  ;;  %p115_p9 = scmp.eq.s32.totalorder %s414_s17, 1 }
  0x13   : > { %p120_p10 = scmp.ne.s32.totalorder %s682_s10, %s678_s9  ;;  %p121_p11 = scmp.eq.s32.totalorder %s415_s18, 1 }
  0x14   : > { %p794_p12 = por %p115_p9, %p114_p8  ;;  %p456_p1 = scmp.lt.s32.totalorder %s706_s16, 2 }
  0x15   : > { %p799_p0 = por %p121_p11, %p120_p10  ;;  %s708_s27 = smov [#allocation2]  }
  0x16   : > { %s950_s25 = scalar_select %p794_p12, 1, 0 }
  0x17   : > { %s951_s26 = scalar_select %p799_p0, 1, 0 }
  0x18   : > { %s155_s28 = sshll.u32 %s708_s27, 4  ;;  %p806_p2 = pnand %p456_p1, %p776_p4  ;;  %s156_s28 = int_to_ptr.vmem [resolvable:$true] %s155_s28 }
  0x19   : > { %s539_s4 = scalar_lea.hbm %s943_s0, 256 }
  0x1a   : > { %p540_p3 = scmp.ne.s32.totalorder %s943_s0, %s539_s4  ;;  %p541_p5 = pneg %p806_p2 }
  0x1b   : > { %p546_p8 = scmp.lt.u32.totalorder %s539_s4, %s539_s4  ;;  %p548_p9 = scmp.lt.u32.totalorder %s539_s4, %s943_s0 }
  0x1c   : > { %p542_p7 = pnand %p541_p5, %p540_p3 }
  0x1d   : > { %p549_p10 = por %p548_p9, %p546_p8 }
  0x1e   : > { %p543_p4 = pneg %p542_p7 }
  0x20   : > { %p550_p11 = pnand %p549_p10, %p543_p4 }
  0x22   : > { %553 = shalt.err (!%p550_p11)
}
  0x23   : > { %s554_s12 = scalar_lea.vmem %s156_s28, 256  ;;  %s561_s17 = scalar_lea.vmem %s156_s28, 512 }
  0x24   : > { %p555_p1 = scmp.ne.s32.totalorder %s156_s28, %s554_s12  ;;  %p562_p12 = scmp.lt.s32.totalorder %s156_s28, %s156_s28 }
  0x25   : > { %p563_p6 = scmp.lt.s32.totalorder %s561_s17, %s554_s12 }
  0x26   : > { %p557_p13 = pnand %p555_p1, %p541_p5 }
  0x27   : > { %p564_p3 = por %p563_p6, %p562_p12 }
  0x28   : > { %p558_p0 = pneg %p557_p13 }
  0x2a   : > { %p565_p7 = pnand %p564_p3, %p558_p0 }
  0x2c   : > { %568 = shalt.err (!%p565_p7)
}
  0x2d   : > { %s709_s18 = smov 128   ;;  %s710_s20 = smov 8  }
  0x2e   : > { %448 = dma.hbm_to_vmem [thread:$0]  (!%p806_p2), %s943_s0, 256, %s156_s28, [#allocation3], %s709_s18, %s709_s18, %s710_s20  }
  0x2f   : > { %p424_p13 = scmp.ge.s32.totalorder %s706_s16, 1  ;;  %p187_p4 = scmp.lt.s32.totalorder %s706_s16, 3 }
  0x30   : > { %s711_s30 = smov [#allocation5]   ;;  %s569_s6 = scalar_lea.hbm %s944_s1, 256 }
  0x31   : > { %p837_p8 = pnand %p424_p13, %p187_p4  ;;  %s179_s3 = sshll.u32 %s711_s30, 4  ;;  %s180_s3 = int_to_ptr.vmem [resolvable:$true] %s179_s3 }
  0x32   : > { %p570_p6 = scmp.ne.s32.totalorder %s944_s1, %s569_s6  ;;  %p576_p9 = scmp.lt.u32.totalorder %s569_s6, %s569_s6 }
  0x33   : > { %s953_s27 = scalar_select %p837_p8, 1, 0 }
  0x34   : > { %p572_p12 = pnand %p570_p6, %p541_p5  ;;  %p578_p10 = scmp.lt.u32.totalorder %s569_s6, %s944_s1 }
  0x36   : > { %p573_p0 = pneg %p572_p12  ;;  %p579_p11 = por %p578_p10, %p576_p9 }
  0x38   : > { %p580_p1 = pnand %p579_p11, %p573_p0 }
  0x3a   : > { %583 = shalt.err (!%p580_p1)
}
  0x3b   : > { %s584_s17 = scalar_lea.vmem %s180_s3, 256  ;;  %s591_s22 = scalar_lea.vmem %s180_s3, 512 }
  0x3c   : > { %p585_p3 = scmp.ne.s32.totalorder %s180_s3, %s584_s17  ;;  %p592_p4 = scmp.lt.s32.totalorder %s180_s3, %s180_s3 }
  0x3d   : > { %p593_p8 = scmp.lt.s32.totalorder %s591_s22, %s584_s17 }
  0x3e   : > { %p587_p7 = pnand %p585_p3, %p541_p5 }
  0x3f   : > { %p594_p6 = por %p593_p8, %p592_p4 }
  0x40   : > { %p588_p13 = pneg %p587_p7 }
  0x42   : > { %p595_p12 = pnand %p594_p6, %p588_p13 }
  0x44   : > { %598 = shalt.err (!%p595_p12)
}
  0x45   : > { %451 = dma.hbm_to_vmem [thread:$0]  (!%p806_p2), %s944_s1, 256, %s180_s3, [#allocation6], %s709_s18, %s709_s18, %s710_s20  }
  0x46   : > { %p954_p0 = scmp.ne.s32.totalorder %s953_s27, 0 }
  0x47   : > { %s193_s4 = sand.u32 (!%p954_p0), 1, %s694_s13   ;;  %p955_p5 = scmp.ne.s32.totalorder (!%p954_p0), %s949_s21, 0 }
  0x48   : > { %191 = sbr.rel (%p954_p0) target bundleno = 121 (0x79), region = 28  ;;  %s425_s5 = sshll.u32 (!%p954_p0), %s193_s4, 4 }
  0x49   : > { %s194_s6 = scalar_lea.sflag (!%p954_p0), [#allocation3], %s193_s4  ;;  %s197_s7 = scalar_lea.vmem (!%p954_p0), [#allocation2], %s425_s5 }
  0x4f   : > { %664 = dma.done.wait (%p955_p5), %s194_s6, 256  }
  0x50   : > { %666 = vsyncadd (%p955_p5), %s194_s6, 4294967040  ;;  %s203_s29 = scalar_lea.sflag [#allocation6], %s193_s4  ;;  %s206_s8 = scalar_lea.vmem [#allocation5], %s425_s5 }
  0x51   : > { %668 = dma.done.wait (%p955_p5), %s203_s29, 256  }
  0x52   : > { %670 = vsyncadd (%p955_p5), %s203_s29, 4294967040  ;;  %s427_s18 = sshll.u32 %s698_s14, 11  ;;  %v262_v0 = vlaneseq  ;;  %v248_v8 = vld [vmem:[%s197_s7] sm:$0xff]  ;;  %v249_v9 = vld [vmem:[%s197_s7 + $0x8] sm:$0xff]  ;;  %s229_s20 = sand.u32 1, %s682_s10  }
  0x53   : > { %v269_v2 = vstv %s427_s18  ;;  %v252_v10 = vmul.f32 0.5, %v248_v8  ;;  %v253_v11 = vmul.f32 0.5, %v249_v9  ;;  %v250_v15 = vld [vmem:[%s206_s8] sm:$0xff]  ;;  %v251_v16 = vld [vmem:[%s206_s8 + $0x8] sm:$0xff]  ;;  %s438_s21 = smul.u32 24, %s229_s20  ;;  %s891_s23 = scalar_lea.sflag [#allocation4], %s229_s20 }
  0x54   : > { %v263_v1 = vshrl.u32 %v262_v0, 7  ;;  %v266_v4 = vand.u32 127, %v262_v0  ;;  %s437_s3 = smul.u32 384, %s698_s14  ;;  %p956_p8 = scmp.ne.s32.totalorder %s950_s25, 0 }
  0x55   : > { %535 = vtanh.f32 %v252_v10  ;;  %s231_s27 = scalar_lea.vmem [#allocation7], %s438_s21  ;;  %s712_s14 = smov [#allocation7]  }
  0x56   : > { %v264_v3 = vadd.s32 8, %v263_v1  ;;  %v267_v5 = vmul.u32 128, %v263_v1  ;;  %537 = vtanh.f32 %v253_v11  ;;  %s310_s28 = sshll.u32 %s231_s27, 4  ;;  %s885_s22 = scalar_lea.hbm %s945_s2, %s437_s3  ;;  %s887_s28 = int_to_ptr.vmem [resolvable:$true] %s310_s28 }
  0x57   : > { %s599_s30 = scalar_lea.vmem %s887_s28, 384  ;;  %s603_s4 = sshll.u32 %s712_s14, 4  ;;  %s604_s4 = int_to_ptr.vmem [resolvable:$false] %s603_s4 }
  0x58   : > { %v268_v6 = vmul.u32 128, %v264_v3  ;;  %v270_v7 = vadd.s32 %v269_v2, %v267_v5  ;;  %p600_p2 = scmp.ne.s32.totalorder %s887_s28, %s599_s30  ;;  %s605_s5 = scalar_lea.vmem %s604_s4, 768 }
  0x59   : > { %p606_p11 = scmp.lt.s32.totalorder %s887_s28, %s604_s4  ;;  %p607_p1 = scmp.lt.s32.totalorder %s605_s5, %s599_s30 }
  0x5a   : > { %v271_v12 = vadd.s32 %v269_v2, %v268_v6  ;;  %v272_v13 = vadd.s32 %v270_v7, %v266_v4  ;;  %p601_p9 = pnand %p600_p2, %p956_p8 }
  0x5b   : > { %p608_p3 = por %p607_p1, %p606_p11 }
  0x5c   : > { %v273_v14 = vadd.s32 %v271_v12, %v266_v4  ;;  %vm274_vm0 = vcmp.lt.s32.totalorder %v272_v13, 2048  ;;  %p602_p10 = pneg %p601_p9 }
  0x5d   : > { %v278_v17 = vsel %vm274_vm0, %v250_v15, 0.0 }
  0x5e   : > { %vm275_vm1 = vcmp.lt.s32.totalorder %v273_v14, 2048  ;;  %p609_p7 = pnand %p608_p3, %p602_p10 }
  0x5f   : > { %v279_v18 = vsel %vm275_vm1, %v251_v16, 0.0  ;;  %v536_v20 = vpop.eup %535 }
  0x60   : > { %v286_v19 = vadd.f32 %v279_v18, %v278_v17  ;;  %v538_v21 = vpop.eup %537  ;;  %v256_v22 = vmul.f32 0.5, %v536_v20 }
  0x61   : > { %v257_v23 = vmul.f32 0.5, %v538_v21 }
  0x62   : > { %429 = vst [vmem:[%s231_s27 + $0x8] sm:$0xff] %v286_v19  ;;  %v258_v24 = vadd.f32 0.5, %v256_v22 }
  0x63   : > { %v259_v25 = vadd.f32 0.5, %v257_v23 }
  0x64   : > { %v276_v26 = vsel %vm274_vm0, %v258_v24, 0.0 }
  0x65   : > { %v277_v27 = vsel %vm275_vm1, %v259_v25, 0.0  ;;  %v291_v28 = vmul.f32 %v278_v17, %v276_v26 }
  0x66   : > { %v281_v29 = vadd.f32 %v277_v27, %v276_v26  ;;  %v292_v30 = vmul.f32 %v279_v18, %v277_v27 }
  0x68   : > { %v293_v31 = vadd.f32 %v292_v30, %v291_v28  ;;  %283 = vst [vmem:[%s231_s27] sm:$0xff] %v281_v29 }
  0x6a   : > { %431 = vst [vmem:[%s231_s27 + $0x10] sm:$0xff] %v293_v31 }
  0x6b   : > { %612 = shalt.err (!%p609_p7)
}
  0x6c   : > { %s613_s6 = scalar_lea.hbm %s885_s22, 384  ;;  %s617_s8 = scalar_lea.hbm %s945_s2, 768 }
  0x6d   : > { %p614_p13 = scmp.ne.s32.totalorder %s885_s22, %s613_s6  ;;  %p618_p12 = scmp.lt.u32.totalorder %s885_s22, %s945_s2 }
  0x6e   : > { %p619_p0 = scmp.lt.u32.totalorder %s617_s8, %s613_s6  ;;  %p621_p2 = scmp.lt.u32.totalorder %s613_s6, %s885_s22 }
  0x6f   : > { %p615_p4 = pnand %p614_p13, %p956_p8 }
  0x70   : > { %p620_p5 = por %p619_p0, %p618_p12 }
  0x71   : > { %p616_p6 = pneg %p615_p4 }
  0x72   : > { %p622_p9 = por %p621_p2, %p620_p5 }
  0x74   : > { %p623_p10 = pnand %p622_p9, %p616_p6 }
  0x76   : > { %626 = shalt.err (!%p623_p10)
}
  0x77   : > { %s713_s21 = smov 128   ;;  %s714_s27 = smov 8  }
  0x78   : > { %443 = dma.vmem_to_hbm [thread:$0]  (%p956_p8), %s887_s28, 384, %s885_s22, %s891_s23, %s713_s21, %s713_s21, %s714_s27  }
  0x79 PF: > { %s325_s3 = sand.u32 1, %s678_s9   ;;  %p957_p11 = scmp.ne.s32.totalorder %s951_s26, 0 }
  0x7a   : > { %p958_p1 = scmp.ge.s32.totalorder %s706_s16, 2  ;;  %s326_s12 = scalar_lea.sflag [#allocation4], %s325_s3 }
  0x7c   : > { %p453_p3 = pnand %p958_p1, %p957_p11 }
  0x7e   : > { %672 = dma.done.wait (!%p453_p3), %s326_s12, 384  }
  0x7f   : > { %674 = vsyncadd (!%p453_p3), %s326_s12, 4294966912  ;;  %s21_s16 = sadd.s32 1, %s706_s16   ;;  %s959_s9 = smov %s682_s10 }
  0x80   : > { %p18_p7 = scmp.ge.s32.totalorder %s21_s16, 4   ;;  %s960_s10 = smov %s686_s11 }
  0x81   : > { %s961_s11 = smov %s788_s24  ;;  %s962_s12 = smov %s694_s13 }
  0x82   : > { %s933_s13 = smov 0   ;;  %s963_s14 = smov %s702_s15 }
  0x83   : > { %s964_s15 = smov %s966_s19  ;;  %20 = sbr.rel (!%p18_p7) target bundleno = 9 (0x9), region = 92 }
  0x8a   :  { %331 = vsyncpa [#allocation3], 1 }
  0x8b   :  { %333 = vsyncpa [#allocation3 + $0x1], 1 }
  0x8c   :  { %334 = vsyncpa [#allocation6], 1 }
  0x8d   :  { %336 = vsyncpa [#allocation6 + $0x1], 1 }
  0x8e   :  { %337 = vsyncpa [#allocation4], 1 }
  0x8f   :  { %339 = vsyncpa [#allocation4 + $0x1], 1 }

</bundles_post_ra>
